<compile_context>
chip_gen: v7x
topology: tpu7x:2x2x1
jax: 0.10.0
libtpu: 0.0.40
codegen_flags: <defaults>
</compile_context>

<pallas_src>
import jax
import jax.numpy as jnp
from jax.experimental import pallas as pl
from jax.experimental.pallas import tpu as pltpu

P_DROP = 0.5                                 # torch F.dropout default p
N_DROPOUTS = 5                               # five chained dropout calls
KEEP_BITS = (1 << N_DROPOUTS) - 1            # 0x1F -> keep prob 1/32
SCALE = (1.0 / (1.0 - P_DROP)) ** N_DROPOUTS # 2**5 = 32.0

LANES = 128
MAX_BLOCK_ROWS = 2048                        # 2048*128*4B = 1 MiB per f32 block


def _round_up(x, m):
    return ((x + m - 1) // m) * m


# ----------------------------------------------------------------------------
# Kernel: hardware PRNG path (TPU).
# ----------------------------------------------------------------------------
def dropout_chain_kernel_hw(seed_ref, x_ref, o_ref):
    # Per-block seeding so each tile draws an independent mask.
    pltpu.prng_seed(seed_ref[0], pl.program_id(0))
    bits = pltpu.prng_random_bits(x_ref.shape)
    keep = (bits & KEEP_BITS) == KEEP_BITS           # 5 iid fair bits all set
    scaled = x_ref[...].astype(jnp.float32) * jnp.float32(SCALE)
    o_ref[...] = jnp.where(keep, scaled, 0.0).astype(o_ref.dtype)


# ----------------------------------------------------------------------------
# Kernel: counter-hash fallback (interpret / non-TPU backends).
# ----------------------------------------------------------------------------
def _fmix32(x):
    """Murmur3 32-bit finalizer (plain u32 VPU ops only)."""
    x = x ^ (x >> jnp.uint32(16))
    x = x * jnp.uint32(0x85EBCA6B)
    x = x ^ (x >> jnp.uint32(13))
    x = x * jnp.uint32(0xC2B2AE35)
    x = x ^ (x >> jnp.uint32(16))
    return x


def dropout_chain_kernel_hash(seed_ref, x_ref, o_ref):
    rows, cols = x_ref.shape
    blk = pl.program_id(0).astype(jnp.uint32)
    r = jax.lax.broadcasted_iota(jnp.int32, (rows, cols), 0).astype(jnp.uint32)
    c = jax.lax.broadcasted_iota(jnp.int32, (rows, cols), 1).astype(jnp.uint32)
    # Global element counter (includes the block offset so tiles differ).
    ctr = (blk * jnp.uint32(rows) + r) * jnp.uint32(cols) + c
    seed = seed_ref[0].astype(jnp.uint32)
    bits = _fmix32(ctr ^ (seed * jnp.uint32(0x9E3779B9) + jnp.uint32(0x9E3779B9)))
    keep = (bits >> jnp.uint32(27)) == jnp.uint32(KEEP_BITS)   # high 5 bits
    scaled = x_ref[...].astype(jnp.float32) * jnp.float32(SCALE)
    o_ref[...] = jnp.where(keep, scaled, 0.0).astype(o_ref.dtype)


# ----------------------------------------------------------------------------
# Wrapper
# ----------------------------------------------------------------------------
@jax.jit
def model_forward(x, seed):
    """Equivalent of Model.forward(x1): 5 chained training-mode dropouts (p=0.5)."""
    orig_shape = x.shape
    dtype = x.dtype
    n = x.size

    # Sublane/lane-dense padded layout: (padded_rows, 128), rows % 8 == 0.
    rows = pl.cdiv(n, LANES)
    block_rows = min(MAX_BLOCK_ROWS, _round_up(rows, 8))
    padded_rows = _round_up(rows, block_rows)
    padded_n = padded_rows * LANES
    num_blocks = padded_rows // block_rows

    flat = jnp.ravel(x)
    flat = jnp.pad(flat, (0, padded_n - n))
    slab = flat.reshape(padded_rows, LANES)

    seed_arr = jnp.asarray(seed, jnp.int32).reshape(1)

    on_tpu = jax.default_backend() == "tpu"
    kernel = dropout_chain_kernel_hw if on_tpu else dropout_chain_kernel_hash

    out = pl.pallas_call(
        kernel,
        out_shape=jax.ShapeDtypeStruct((padded_rows, LANES), dtype),
        grid=(num_blocks,),
        in_specs=[
            pl.BlockSpec(memory_space=pltpu.MemorySpace.SMEM),   # seed scalar
            pl.BlockSpec((block_rows, LANES), lambda i: (i, 0)),
        ],
        out_specs=pl.BlockSpec((block_rows, LANES), lambda i: (i, 0)),
        compiler_params=pltpu.CompilerParams(
            dimension_semantics=("parallel",),
            vmem_limit_bytes=32 * 1024 * 1024,
        ),
        cost_estimate=pl.CostEstimate(
            flops=2 * n,
            transcendentals=0,
            bytes_accessed=2 * n * dtype.itemsize,
        ),
    )(seed_arr, slab)

    return out.reshape(-1)[:n].reshape(orig_shape)


if __name__ == "__main__":
    key = jax.random.PRNGKey(0)
    # Same shape as the PyTorch script: x1 = torch.randn(1, 2, 2)
    x1 = jax.random.normal(key, (1, 2, 2), dtype=jnp.float32)

    # NOTE: vary `seed` per call to get fresh dropout masks (PyTorch draws new
    # randomness every forward).
    y = model_forward(x1, jnp.int32(0))
    jax.block_until_ready(y)

    assert y.shape == x1.shape and y.dtype == x1.dtype
    # Every element must be either exactly dropped (0) or x * 2^5 (the fused
    # scale of five p=0.5 dropouts).
    scaled = jnp.float32(SCALE) * x1
    ok = (y == 0) | (jnp.abs(y - scaled) <= 1e-4 * jnp.maximum(1.0, jnp.abs(scaled)))
    assert bool(jnp.all(ok))

    print("KERNEL_OK")
</pallas_src>

<mosaic_0001>
module attributes {stable_mosaic.version = 11 : i64} {
  func.func @dropout_chain_kernel_hash(%arg0: i32, %arg1: memref<1xi32, #tpu.memory_space<smem>>, %arg2: memref<8x128xf32, #tpu.memory_space<vmem>>, %arg3: memref<8x128xf32, #tpu.memory_space<vmem>>) attributes {dimension_semantics = [#tpu.dimension_semantics<parallel>], iteration_bounds = array<i64: 1>, scalar_prefetch = 0 : i64, scratch_operands = 0 : i64, tpu.core_type = #tpu.core_type<tc>, window_params = [{transform_indices = @transform_0, window_bounds = array<i64: 1>}, {transform_indices = @transform_1, window_bounds = array<i64: 8, 128>}, {transform_indices = @transform_2, window_bounds = array<i64: 8, 128>}]} {
    %0 = tpu.iota {dimensions = array<i32: 0>} : vector<8x128xi32>
    %1 = tpu.iota {dimensions = array<i32: 1>} : vector<8x128xi32>
    %c8_i32 = arith.constant 8 : i32
    %2 = arith.muli %arg0, %c8_i32 : i32
    %3 = vector.broadcast %2 : i32 to vector<8x128xi32>
    %4 = arith.addi %3, %0 : vector<8x128xi32>
    %c128_i32 = arith.constant 128 : i32
    %5 = vector.broadcast %c128_i32 : i32 to vector<8x128xi32>
    %6 = arith.muli %4, %5 : vector<8x128xi32>
    %7 = arith.addi %6, %1 : vector<8x128xi32>
    %c0 = arith.constant 0 : index
    %8 = memref.load %arg1[%c0] : memref<1xi32, #tpu.memory_space<smem>>
    %c-1640531527_i32 = arith.constant -1640531527 : i32
    %9 = arith.muli %8, %c-1640531527_i32 : i32
    %c-1640531527_i32_0 = arith.constant -1640531527 : i32
    %10 = arith.addi %9, %c-1640531527_i32_0 : i32
    %11 = vector.broadcast %10 : i32 to vector<8x128xi32>
    %12 = arith.xori %7, %11 : vector<8x128xi32>
    %c16_i32 = arith.constant 16 : i32
    %13 = vector.broadcast %c16_i32 : i32 to vector<8x128xi32>
    %14 = arith.shrui %12, %13 : vector<8x128xi32>
    %15 = arith.xori %12, %14 : vector<8x128xi32>
    %c-2048144789_i32 = arith.constant -2048144789 : i32
    %16 = vector.broadcast %c-2048144789_i32 : i32 to vector<8x128xi32>
    %17 = arith.muli %15, %16 : vector<8x128xi32>
    %c13_i32 = arith.constant 13 : i32
    %18 = vector.broadcast %c13_i32 : i32 to vector<8x128xi32>
    %19 = arith.shrui %17, %18 : vector<8x128xi32>
    %20 = arith.xori %17, %19 : vector<8x128xi32>
    %c-1028477387_i32 = arith.constant -1028477387 : i32
    %21 = vector.broadcast %c-1028477387_i32 : i32 to vector<8x128xi32>
    %22 = arith.muli %20, %21 : vector<8x128xi32>
    %c16_i32_1 = arith.constant 16 : i32
    %23 = vector.broadcast %c16_i32_1 : i32 to vector<8x128xi32>
    %24 = arith.shrui %22, %23 : vector<8x128xi32>
    %25 = arith.xori %22, %24 : vector<8x128xi32>
    %c27_i32 = arith.constant 27 : i32
    %26 = vector.broadcast %c27_i32 : i32 to vector<8x128xi32>
    %27 = arith.shrui %25, %26 : vector<8x128xi32>
    %c31_i32 = arith.constant 31 : i32
    %28 = vector.broadcast %c31_i32 : i32 to vector<8x128xi32>
    %29 = arith.cmpi eq, %27, %28 : vector<8x128xi32>
    %c0_2 = arith.constant 0 : index
    %c0_3 = arith.constant 0 : index
    %30 = vector.load %arg2[%c0_2, %c0_3] : memref<8x128xf32, #tpu.memory_space<vmem>>, vector<8x128xf32>
    %cst = arith.constant 3.200000e+01 : f32
    %31 = vector.broadcast %cst : f32 to vector<8x128xf32>
    %32 = arith.mulf %30, %31 : vector<8x128xf32>
    %cst_4 = arith.constant 0.000000e+00 : f32
    %33 = vector.broadcast %cst_4 : f32 to vector<8x128xf32>
    %34 = arith.select %29, %32, %33 : vector<8x128xi1>, vector<8x128xf32>
    %c0_5 = arith.constant 0 : index
    %c0_6 = arith.constant 0 : index
    %35 = vector.load %arg3[%c0_5, %c0_6] : memref<8x128xf32, #tpu.memory_space<vmem>>, vector<8x128xf32>
    tpu.vector_store %arg3[%c0_5, %c0_6], %34 {strides = array<i32>} : memref<8x128xf32, #tpu.memory_space<vmem>>, vector<8x128xf32>,
    return
  }
  func.func @transform_0(%arg0: i32) -> i32 {
    %c0_i32 = arith.constant 0 : i32
    %c0_i32_0 = arith.constant 0 : i32
    return %c0_i32 : i32
  }
  func.func @transform_1(%arg0: i32) -> (i32, i32) {
    %c0_i32 = arith.constant 0 : i32
    %c0_i32_0 = arith.constant 0 : i32
    return %arg0, %c0_i32 : i32, i32
  }
  func.func @transform_2(%arg0: i32) -> (i32, i32) {
    %c0_i32 = arith.constant 0 : i32
    %c0_i32_0 = arith.constant 0 : i32
    return %arg0, %c0_i32 : i32, i32
  }
}

</mosaic_0001>

<bundles_post_ra>
// kernel: model_forward.1
= control target key start
LH: loop header
LB: loop body
LE: loop exit
PB: predicated region body
PF: predicated region fallthrough
CT: control target
= control target key end

     0   :  { %v12_v0 = vlaneseq  ;;  %s68_s0 = inlined_call_operand.<no memory space> [shape: s32[1], index: 0, kind: input, shape index: {}]   ;;  %s69_s1 = inlined_call_operand.vmem [shape: f32[8,128], index: 1, kind: input, shape index: {}]   ;;  %s70_s2 = inlined_call_operand.vmem [shape: f32[8,128], index: 2, kind: output, shape index: {}]  }
   0x1   :  { %s22_s11 = smul.u32 2654435769, %s68_s0  ;;  %v36_v14 = vld [vmem:[%s69_s1] sm:$0xff] }
   0x2   :  { %v13_v1 = vshrl.u32 %v12_v0, 7  ;;  %v15_v2 = vand.u32 127, %v12_v0  ;;  %v37_v16 = vmul.f32 32.0, %v36_v14 }
   0x3   :  { %s23_s12 = sadd.s32 2654435769, %s22_s11 }
   0x4   :  { %v19_v3 = vmul.u32 128, %v13_v1  ;;  %v24_v4 = vstv %s23_s12 }
   0x6   :  { %v20_v5 = vadd.s32 %v19_v3, %v15_v2 }
   0x8   :  { %v25_v6 = vxor.u32 %v24_v4, %v20_v5 }
   0xa   :  { %v26_v7 = vshrl.u32 %v25_v6, 16 }
   0xc   :  { %v27_v8 = vxor.u32 %v26_v7, %v25_v6 }
   0xe   :  { %v28_v9 = vmul.u32 2246822507, %v27_v8 }
  0x10   :  { %v29_v10 = vshrl.u32 %v28_v9, 13 }
  0x12   :  { %v30_v11 = vxor.u32 %v29_v10, %v28_v9 }
  0x14   :  { %v31_v12 = vmul.u32 3266489909, %v30_v11 }
  0x16   :  { %v32_v13 = vshrl.u32 %v31_v12, 16 }
  0x18   :  { %v33_v15 = vxor.u32 %v32_v13, %v31_v12 }
  0x1a   :  { %v34_v17 = vshrl.u32 %v33_v15, 27 }
  0x1c   :  { %vm35_vm0 = vcmp.eq.s32.totalorder %v34_v17, 31 }
  0x1d   :  { %v38_v18 = vsel %vm35_vm0, %v37_v16, 0.0 }
  0x1e   :  { %39 = vst [vmem:[%s70_s2] sm:$0xff] %v38_v18 }

</bundles_post_ra>
